<compile_context>
chip_gen: v5e
topology: v5e:2x2
jax: 0.10.0
libtpu: 0.0.40
codegen_flags: <defaults>
</compile_context>

<pallas_src>
import jax
import jax.numpy as jnp
from jax.experimental import pallas as pl
from jax.experimental.pallas import tpu as pltpu


def mlp_kernel(x_ref, w1_ref, b1_ref, w2_ref, b2_ref, o_ref):
    # x_ref:  (TB, D)  f32 flattened input tile (cast to bf16 in-kernel)
    # w1_ref: (D,  H)  bf16 first linear weight (in, out), VMEM-resident
    # b1_ref: (1,  H)  f32 first bias
    # w2_ref: (H,  O)  bf16 second linear weight (in, out), VMEM-resident
    # b2_ref: (1,  O)  f32 second bias
    # o_ref:  (TB, O)  f32 logits tile
    x = x_ref[...].astype(w1_ref.dtype)                      # f32 -> bf16 (VPU, cheap)
    h = jnp.dot(x, w1_ref[...], preferred_element_type=jnp.float32)
    h = jnp.maximum(h + b1_ref[...], 0.0)                    # bias + ReLU in f32
    out = jnp.dot(h.astype(w2_ref.dtype), w2_ref[...],
                  preferred_element_type=jnp.float32)
    o_ref[...] = (out + b2_ref[...]).astype(o_ref.dtype)


def _round_up(x: int, m: int) -> int:
    return (x + m - 1) // m * m


def prepare_params(w1, b1, w2, b2, compute_dtype=jnp.bfloat16):
    """One-time weight prep (do at model load, not per call): bf16 weights,
    f32 biases shaped (1, H) / (1, O)."""
    return (w1.astype(compute_dtype),
            b1.reshape(1, -1).astype(jnp.float32),
            w2.astype(compute_dtype),
            b2.reshape(1, -1).astype(jnp.float32))


def fashion_mnist_model_v1(x_nchw, params, *, batch_tile: int = 1024):
    """Forward pass of FashionMNISTModelV1.

    x_nchw: (B, C, H, W) float32
    params: output of prepare_params -> (w1 (D,H) bf16, b1 (1,H) f32,
                                         w2 (H,O) bf16, b2 (1,O) f32)
    returns logits (B, O) float32
    """
    w1, b1, w2, b2 = params
    B = x_nchw.shape[0]
    D = x_nchw.shape[1] * x_nchw.shape[2] * x_nchw.shape[3]
    H = w1.shape[1]
    O = w2.shape[1]
    assert w1.shape[0] == D and w2.shape[0] == H

    # nn.Flatten (row-major, same layout as torch).  No pad, no dtype copy.
    x_flat = x_nchw.reshape(B, D)

    # Adaptive batch tile: avoid a mostly-padding last tile, and for B >= 16
    # keep >= 2 grid steps so the parallel batch axis shards across v7x's 2 TCs.
    n_tiles = pl.cdiv(B, batch_tile)
    if B >= 16:
        n_tiles = max(n_tiles, 2)
    TB = _round_up(pl.cdiv(B, n_tiles), 8)
    grid = (pl.cdiv(B, TB),)   # partial last tile handled by Pallas masking

    w_itm = jnp.dtype(w1.dtype).itemsize
    cost = pl.CostEstimate(
        flops=2 * B * D * H + 2 * B * H * O,
        transcendentals=0,
        bytes_accessed=(B * D * 4          # x (f32, read once)
                        + D * H * w_itm    # w1
                        + H * O * w_itm    # w2
                        + (H + O) * 4      # biases
                        + B * O * 4),      # out (f32)
    )

    out = pl.pallas_call(
        mlp_kernel,
        out_shape=jax.ShapeDtypeStruct((B, O), jnp.float32),
        grid_spec=pltpu.PrefetchScalarGridSpec(
            num_scalar_prefetch=0,
            grid=grid,
            in_specs=[
                pl.BlockSpec((TB, D), lambda i: (i, 0)),   # x: tiled over batch
                pl.BlockSpec((D, H), lambda i: (0, 0)),    # w1: VMEM-resident (full block)
                pl.BlockSpec((1, H), lambda i: (0, 0)),    # b1: VMEM-resident
                pl.BlockSpec((H, O), lambda i: (0, 0)),    # w2: VMEM-resident (full block)
                pl.BlockSpec((1, O), lambda i: (0, 0)),    # b2: VMEM-resident
            ],
            out_specs=pl.BlockSpec((TB, O), lambda i: (i, 0)),
        ),
        compiler_params=pltpu.CompilerParams(
            dimension_semantics=("parallel",),   # batch axis shards across v7x's 2 TCs
        ),
        cost_estimate=cost,
    )(x_flat, w1, b1, w2, b2)

    return out


def init_params(key, input_shape, hidden_units, output_shape):
    """Deterministic init mimicking nn.Linear's uniform(-1/sqrt(fan_in), 1/sqrt(fan_in))."""
    k1, k2, k3, k4 = jax.random.split(key, 4)
    bound1 = 1.0 / jnp.sqrt(jnp.float32(input_shape))
    bound2 = 1.0 / jnp.sqrt(jnp.float32(hidden_units))
    w1 = jax.random.uniform(k1, (input_shape, hidden_units), jnp.float32, -bound1, bound1)
    b1 = jax.random.uniform(k2, (hidden_units,), jnp.float32, -bound1, bound1)
    w2 = jax.random.uniform(k3, (hidden_units, output_shape), jnp.float32, -bound2, bound2)
    b2 = jax.random.uniform(k4, (output_shape,), jnp.float32, -bound2, bound2)
    return w1, b1, w2, b2


if __name__ == "__main__":
    # FashionMNIST-like small example: batch=8, 1x28x28 images,
    # input_shape=784, hidden_units=32, output_shape=10.
    B, C, Himg, Wimg = 8, 1, 28, 28
    input_shape = C * Himg * Wimg
    hidden_units = 32
    output_shape = 10

    key = jax.random.PRNGKey(0)
    kx, kp = jax.random.split(key)
    x = jax.random.normal(kx, (B, C, Himg, Wimg), dtype=jnp.float32)
    w1, b1, w2, b2 = init_params(kp, input_shape, hidden_units, output_shape)
    params = prepare_params(w1, b1, w2, b2)   # one-time bf16 cast / bias reshape

    logits = fashion_mnist_model_v1(x, params)
    jax.block_until_ready(logits)
    assert logits.shape == (B, output_shape)

    # Reference 1: same bf16-weight / f32-accumulate path in pure JAX (tight check).
    x_flat = x.reshape(B, -1)
    xb = x_flat.astype(jnp.bfloat16)
    w1b = w1.astype(jnp.bfloat16)
    w2b = w2.astype(jnp.bfloat16)
    h_ref = jnp.maximum(
        jnp.dot(xb, w1b, preferred_element_type=jnp.float32) + b1, 0.0)
    ref_bf16 = jnp.dot(h_ref.astype(jnp.bfloat16), w2b,
                       preferred_element_type=jnp.float32) + b2
    assert jnp.allclose(logits, ref_bf16, atol=1e-3, rtol=1e-3)

    # Reference 2: full f32 PyTorch-equivalent forward (loose check — bf16 weights
    # change logits at ~1e-2 level, expected and acceptable for classification).
    ref_f32 = jnp.maximum(x_flat @ w1 + b1, 0.0) @ w2 + b2
    assert jnp.allclose(logits, ref_f32, atol=5e-2, rtol=5e-2)

    print("KERNEL_OK")
</pallas_src>

<mosaic_0001>
module attributes {stable_mosaic.version = 11 : i64} {
  func.func @mlp_kernel(%arg0: i32, %arg1: memref<8x784xf32, #tpu.memory_space<vmem>>, %arg2: memref<784x32xbf16, #tpu.memory_space<vmem>>, %arg3: memref<1x32xf32, #tpu.memory_space<vmem>>, %arg4: memref<32x10xbf16, #tpu.memory_space<vmem>>, %arg5: memref<1x10xf32, #tpu.memory_space<vmem>>, %arg6: memref<8x10xf32, #tpu.memory_space<vmem>>) attributes {dimension_semantics = [#tpu.dimension_semantics<parallel>], iteration_bounds = array<i64: 1>, scalar_prefetch = 0 : i64, scratch_operands = 0 : i64, tpu.core_type = #tpu.core_type<tc>, window_params = [{transform_indices = @transform_0, window_bounds = array<i64: 8, 784>}, {pipeline_mode = #tpu.pipeline_mode<synchronous>, transform_indices = @transform_1, window_bounds = array<i64: 784, 32>}, {pipeline_mode = #tpu.pipeline_mode<synchronous>, transform_indices = @transform_2, window_bounds = array<i64: 1, 32>}, {pipeline_mode = #tpu.pipeline_mode<synchronous>, transform_indices = @transform_3, window_bounds = array<i64: 32, 10>}, {pipeline_mode = #tpu.pipeline_mode<synchronous>, transform_indices = @transform_4, window_bounds = array<i64: 1, 10>}, {transform_indices = @transform_5, window_bounds = array<i64: 8, 10>}]} {
    %c0 = arith.constant 0 : index
    %c0_0 = arith.constant 0 : index
    %0 = vector.load %arg1[%c0, %c0_0] : memref<8x784xf32, #tpu.memory_space<vmem>>, vector<8x784xf32>
    %1 = arith.truncf %0 : vector<8x784xf32> to vector<8x784xbf16>
    %c0_1 = arith.constant 0 : index
    %c0_2 = arith.constant 0 : index
    %2 = vector.load %arg2[%c0_1, %c0_2] : memref<784x32xbf16, #tpu.memory_space<vmem>>, vector<784x32xbf16>
    %cst = arith.constant dense<0.000000e+00> : vector<8x32xf32>
    %3 = tpu.matmul %1, %2, %cst {dimension_numbers = #tpu.dot_dimension_numbers<[1], [0], [0], [1], [0, 0, 1, 1], [], []>} : vector<8x784xbf16>, vector<784x32xbf16>, vector<8x32xf32> -> vector<8x32xf32>
    %c0_3 = arith.constant 0 : index
    %c0_4 = arith.constant 0 : index
    %4 = vector.load %arg3[%c0_3, %c0_4] : memref<1x32xf32, #tpu.memory_space<vmem>>, vector<1x32xf32>
    %5 = vector.broadcast %4 : vector<1x32xf32> to vector<8x32xf32>
    %6 = arith.addf %3, %5 : vector<8x32xf32>
    %cst_5 = arith.constant 0.000000e+00 : f32
    %7 = vector.broadcast %cst_5 : f32 to vector<8x32xf32>
    %8 = arith.maximumf %6, %7 : vector<8x32xf32>
    %9 = arith.truncf %8 : vector<8x32xf32> to vector<8x32xbf16>
    %c0_6 = arith.constant 0 : index
    %c0_7 = arith.constant 0 : index
    %10 = vector.load %arg4[%c0_6, %c0_7] : memref<32x10xbf16, #tpu.memory_space<vmem>>, vector<32x10xbf16>
    %cst_8 = arith.constant dense<0.000000e+00> : vector<8x10xf32>
    %11 = tpu.matmul %9, %10, %cst_8 {dimension_numbers = #tpu.dot_dimension_numbers<[1], [0], [0], [1], [0, 0, 1, 1], [], []>} : vector<8x32xbf16>, vector<32x10xbf16>, vector<8x10xf32> -> vector<8x10xf32>
    %c0_9 = arith.constant 0 : index
    %c0_10 = arith.constant 0 : index
    %12 = vector.load %arg5[%c0_9, %c0_10] : memref<1x10xf32, #tpu.memory_space<vmem>>, vector<1x10xf32>
    %13 = vector.broadcast %12 : vector<1x10xf32> to vector<8x10xf32>
    %14 = arith.addf %11, %13 : vector<8x10xf32>
    %c0_11 = arith.constant 0 : index
    %c0_12 = arith.constant 0 : index
    %15 = vector.load %arg6[%c0_11, %c0_12] : memref<8x10xf32, #tpu.memory_space<vmem>>, vector<8x10xf32>
    tpu.vector_store %arg6[%c0_11, %c0_12], %14 {strides = array<i32>} : memref<8x10xf32, #tpu.memory_space<vmem>>, vector<8x10xf32>,
    return
  }
  func.func @transform_0(%arg0: i32) -> (i32, i32) {
    %c0_i32 = arith.constant 0 : i32
    %c0_i32_0 = arith.constant 0 : i32
    return %arg0, %c0_i32 : i32, i32
  }
  func.func @transform_1(%arg0: i32) -> (i32, i32) {
    %c0_i32 = arith.constant 0 : i32
    %c0_i32_0 = arith.constant 0 : i32
    %c0_i32_1 = arith.constant 0 : i32
    return %c0_i32, %c0_i32_0 : i32, i32
  }
  func.func @transform_2(%arg0: i32) -> (i32, i32) {
    %c0_i32 = arith.constant 0 : i32
    %c0_i32_0 = arith.constant 0 : i32
    %c0_i32_1 = arith.constant 0 : i32
    return %c0_i32, %c0_i32_0 : i32, i32
  }
  func.func @transform_3(%arg0: i32) -> (i32, i32) {
    %c0_i32 = arith.constant 0 : i32
    %c0_i32_0 = arith.constant 0 : i32
    %c0_i32_1 = arith.constant 0 : i32
    return %c0_i32, %c0_i32_0 : i32, i32
  }
  func.func @transform_4(%arg0: i32) -> (i32, i32) {
    %c0_i32 = arith.constant 0 : i32
    %c0_i32_0 = arith.constant 0 : i32
    %c0_i32_1 = arith.constant 0 : i32
    return %c0_i32, %c0_i32_0 : i32, i32
  }
  func.func @transform_5(%arg0: i32) -> (i32, i32) {
    %c0_i32 = arith.constant 0 : i32
    %c0_i32_0 = arith.constant 0 : i32
    return %arg0, %c0_i32 : i32, i32
  }
}

</mosaic_0001>

<bundles_post_ra>
// kernel: tpu_custom_call.1
= control target key start
LH: loop header
LB: loop body
LE: loop exit
PB: predicated region body
PF: predicated region fallthrough
CT: control target
= control target key end

     0   :  { %s1084_s0 = inlined_call_operand.vmem [shape: f32[8,784], index: 0, kind: input, shape index: {}]   ;;  %s1085_s1 = inlined_call_operand.vmem [shape: bf16[784,32], index: 1, kind: input, shape index: {}]   ;;  %s1086_s2 = inlined_call_operand.vmem [shape: f32[1,32], index: 2, kind: input, shape index: {}]   ;;  %s1087_s3 = inlined_call_operand.vmem [shape: bf16[32,10], index: 3, kind: input, shape index: {}]   ;;  %s1088_s4 = inlined_call_operand.vmem [shape: f32[1,10], index: 4, kind: input, shape index: {}]   ;;  %s1089_s5 = inlined_call_operand.hbm [shape: f32[8,10], index: 5, kind: output, shape index: {}]  }
   0x1   :  { %v797_v0 = vld [vmem:[%s1085_s1 + $0x38] sm:$0xff]  ;;  %v796_v3 = vld [vmem:[%s1085_s1 + $0x30] sm:$0xff]  ;;  %v795_v8 = vld [vmem:[%s1085_s1 + $0x28] sm:$0xff] }
   0x2   :  { %v805_v1 = vld [vmem:[%s1085_s1 + $0x78] sm:$0xff]  ;;  %436 = vmatpush.bf16.msra.mxu0 %v797_v0  ;;  %v804_v4 = vld [vmem:[%s1085_s1 + $0x70] sm:$0xff]  ;;  %v803_v9 = vld [vmem:[%s1085_s1 + $0x68] sm:$0xff] }
   0x3   :  { %v813_v2 = vld [vmem:[%s1085_s1 + $0xb8] sm:$0xff]  ;;  %449 = vmatpush.bf16.msra.mxu1 %v805_v1  ;;  %v812_v5 = vld [vmem:[%s1085_s1 + $0xb0] sm:$0xff]  ;;  %v811_v10 = vld [vmem:[%s1085_s1 + $0xa8] sm:$0xff] }
   0x4   :  { %462 = vmatpush.bf16.msra.mxu2 %v813_v2  ;;  %v821_v6 = vld [vmem:[%s1085_s1 + $0xf8] sm:$0xff]  ;;  %v820_v7 = vld [vmem:[%s1085_s1 + $0xf0] sm:$0xff]  ;;  %v819_v11 = vld [vmem:[%s1085_s1 + $0xe8] sm:$0xff] }
   0x5   :  { %475 = vmatpush.bf16.msra.mxu3 %v821_v6  ;;  %v794_v12 = vld [vmem:[%s1085_s1 + $0x20] sm:$0xff]  ;;  %v793_v16 = vld [vmem:[%s1085_s1 + $0x18] sm:$0xff] }
   0x6   :  { %437 = vmatpush.bf16.msra.mxu0 %v796_v3  ;;  %v802_v13 = vld [vmem:[%s1085_s1 + $0x60] sm:$0xff]  ;;  %v801_v17 = vld [vmem:[%s1085_s1 + $0x58] sm:$0xff] }
   0x7   :  { %450 = vmatpush.bf16.msra.mxu1 %v804_v4  ;;  %v810_v14 = vld [vmem:[%s1085_s1 + $0xa0] sm:$0xff]  ;;  %v809_v18 = vld [vmem:[%s1085_s1 + $0x98] sm:$0xff] }
   0x8   :  { %463 = vmatpush.bf16.msra.mxu2 %v812_v5  ;;  %v818_v15 = vld [vmem:[%s1085_s1 + $0xe0] sm:$0xff] }
   0x9   :  { %476 = vmatpush.bf16.msra.mxu3 %v820_v7 }
   0xa   :  { %438 = vmatpush.bf16.msra.mxu0 %v795_v8 }
   0xb   :  { %451 = vmatpush.bf16.msra.mxu1 %v803_v9 }
   0xc   :  { %464 = vmatpush.bf16.msra.mxu2 %v811_v10 }
   0xd   :  { %477 = vmatpush.bf16.msra.mxu3 %v819_v11 }
   0xe   :  { %439 = vmatpush.bf16.msra.mxu0 %v794_v12 }
   0xf   :  { %452 = vmatpush.bf16.msra.mxu1 %v802_v13 }
  0x10   :  { %465 = vmatpush.bf16.msra.mxu2 %v810_v14 }
  0x11   :  { %10 = vsyncpa [#allocation3], 0  ;;  %478 = vmatpush.bf16.msra.mxu3 %v818_v15  ;;  %v817_v19 = vld [vmem:[%s1085_s1 + $0xd8] sm:$0xff]  ;;  %v792_v20 = vld [vmem:[%s1085_s1 + $0x10] sm:$0xff]  ;;  %vm432_vm0 = vcmask 130048   ;;  %vm549_vm1 = vcmask 261120  }
  0x12   :  { %440 = vmatpush.bf16.msra.mxu0 %v793_v16  ;;  %v800_v21 = vld [vmem:[%s1085_s1 + $0x50] sm:$0xff]  ;;  %v791_v24 = vld [vmem:[%s1085_s1 + $0x8] sm:$0xff]  ;;  %v790_v27 = vld [vmem:[%s1085_s1] sm:$0xff]  ;;  %s870_s9 = smov [#allocation2]   ;;  %s575_s13 = sshll.u32 %s1089_s5, 4  ;;  %vm566_vm2 = vcmask 80896   ;;  %s576_s13 = int_to_ptr.hbm [resolvable:$true] %s575_s13 }
  0x13   :  { %453 = vmatpush.bf16.msra.mxu1 %v801_v17  ;;  %v808_v22 = vld [vmem:[%s1085_s1 + $0x90] sm:$0xff]  ;;  %v799_v25 = vld [vmem:[%s1085_s1 + $0x48] sm:$0xff]  ;;  %v798_v29 = vld [vmem:[%s1085_s1 + $0x40] sm:$0xff]  ;;  %s573_s10 = sshll.u32 %s870_s9, 4  ;;  %s574_s10 = int_to_ptr.vmem [resolvable:$true] %s573_s10 }
  0x14   :  { %466 = vmatpush.bf16.msra.mxu2 %v809_v18  ;;  %v816_v23 = vld [vmem:[%s1085_s1 + $0xd0] sm:$0xff]  ;;  %v807_v26 = vld [vmem:[%s1085_s1 + $0x88] sm:$0xff]  ;;  %v22_v30 = vld [vmem:[%s1084_s0] sm:$0xff] }
  0x15   :  { %479 = vmatpush.bf16.msra.mxu3 %v817_v19  ;;  %v815_v28 = vld [vmem:[%s1085_s1 + $0xc8] sm:$0xff]  ;;  %v829_v32 = vld [vmem:[%s1085_s1 + $0x138] sm:$0xff]  ;;  %v806_v34 = vld [vmem:[%s1085_s1 + $0x80] sm:$0xff]  ;;  %v29_v36 = vpack.c.bf16 %v22_v30, %v22_v30 }
  0x16   :  { %441 = vmatpush.bf16.msra.mxu0 %v792_v20  ;;  %v23_v31 = vld [vmem:[%s1084_s0 + $0x8] sm:$0xff]  ;;  %v837_v33 = vld [vmem:[%s1085_s1 + $0x178] sm:$0xff]  ;;  %v24_v35 = vld [vmem:[%s1084_s0 + $0x10] sm:$0xff] }
  0x17   :  { %454 = vmatpush.bf16.msra.mxu1 %v800_v21  ;;  %v30_v37 = vpack.c.bf16 %v23_v31, %v23_v31  ;;  %v814_v38 = vld [vmem:[%s1085_s1 + $0xc0] sm:$0xff]  ;;  %v25_v40 = vld [vmem:[%s1084_s0 + $0x18] sm:$0xff]  ;;  %v828_v41 = vld [vmem:[%s1085_s1 + $0x130] sm:$0xff]  ;;  %v31_v43 = vpack.c.bf16 %v24_v35, %v24_v35 }
  0x18   :  { %467 = vmatpush.bf16.msra.mxu2 %v808_v22  ;;  %v838_v39 = vld [vmem:[%s1085_s1 + $0x180] sm:$0xff]  ;;  %v836_v42 = vld [vmem:[%s1085_s1 + $0x170] sm:$0xff]  ;;  %v32_v44 = vpack.c.bf16 %v25_v40, %v25_v40  ;;  %v827_v45 = vld [vmem:[%s1085_s1 + $0x128] sm:$0xff] }
  0x19   :  { %480 = vmatpush.bf16.msra.mxu3 %v816_v23  ;;  %v835_v46 = vld [vmem:[%s1085_s1 + $0x168] sm:$0xff]  ;;  %v826_v47 = vld [vmem:[%s1085_s1 + $0x120] sm:$0xff]  ;;  %v825_v49 = vld [vmem:[%s1085_s1 + $0x118] sm:$0xff] }
  0x1a   :  { %442 = vmatpush.bf16.msra.mxu0 %v791_v24  ;;  %v834_v48 = vld [vmem:[%s1085_s1 + $0x160] sm:$0xff]  ;;  %v833_v50 = vld [vmem:[%s1085_s1 + $0x158] sm:$0xff]  ;;  %v28_v51 = vld [vmem:[%s1084_s0 + $0x30] sm:$0xff] }
  0x1b   :  { %455 = vmatpush.bf16.msra.mxu1 %v799_v25  ;;  %v824_v52 = vld [vmem:[%s1085_s1 + $0x110] sm:$0xff]  ;;  %v35_v54 = vpack.c.bf16 %v28_v51, %v28_v51  ;;  %v823_v55 = vld [vmem:[%s1085_s1 + $0x108] sm:$0xff]  ;;  %v822_v57 = vld [vmem:[%s1085_s1 + $0x100] sm:$0xff] }
  0x1c   :  { %468 = vmatpush.bf16.msra.mxu2 %v807_v26  ;;  %v832_v53 = vld [vmem:[%s1085_s1 + $0x150] sm:$0xff]  ;;  %v831_v56 = vld [vmem:[%s1085_s1 + $0x148] sm:$0xff]  ;;  %v830_v58 = vld [vmem:[%s1085_s1 + $0x140] sm:$0xff] }
  0x1d   :  { %481 = vmatpush.bf16.msra.mxu3 %v815_v28  ;;  %v26_v59 = vld [vmem:[%s1084_s0 + $0x20] sm:$0xff]  ;;  %v27_v60 = vld [vmem:[%s1084_s0 + $0x28] sm:$0xff] }
  0x1e   :  { %443 = vmatpush.bf16.msra.mxu0 %v790_v27  ;;  %v33_v61 = vpack.c.bf16 %v26_v59, %v26_v59  ;;  %v34_v62 = vpack.c.bf16 %v27_v60, %v27_v60  ;;  %v840_v63 = vld [vmem:[%s1087_s3 + $0x8] sm:$0xff]  ;;  %v839_v2 = vld [vmem:[%s1087_s3] sm:$0xff] }
  0x1f   :  { %456 = vmatpush.bf16.msra.mxu1 %v798_v29  ;;  %v842_v7 = vld [vmem:[%s1086_s2] ss:$0 sm:$0xff] }
  0x20   :  { %469 = vmatpush.bf16.msra.mxu2 %v806_v34  ;;  %v843_v25 = vld [vmem:[%s1088_s4] ss:$0 sm:$0xff] }
  0x21   :  { %444 = vmatmul.bf16.vlgmr.msra.gmra.mxu0 %v29_v36  ;;  %482 = vmatpush.bf16.msra.mxu3 %v814_v38 }
  0x22   :  { %488 = vmatpush.bf16.msrb.mxu0 %v829_v32  ;;  %457 = vmatmul.bf16.vlgmr.msra.gmra.mxu1 %v30_v37 }
  0x23   :  { %501 = vmatpush.bf16.msrb.mxu1 %v837_v33  ;;  %470 = vmatmul.bf16.vlgmr.msra.gmra.mxu2 %v31_v43 }
  0x24   :  { %521 = vmatpush.bf16.msrb.mxu2 %v838_v39  ;;  %483 = vmatmul.bf16.vlgmr.msra.gmra.mxu3 %v32_v44 }
  0x25   :  { %559 = vmatpush.bf16.msrb.mxu3 %v840_v63 }
  0x26   :  { %489 = vmatpush.bf16.msrb.mxu0 %v828_v41 }
  0x27   :  { %502 = vmatpush.bf16.msrb.mxu1 %v836_v42 }
  0x29   :  { %560 = vmatpush.bf16.msrb.mxu3 %v839_v2 }
  0x2a   :  { %490 = vmatpush.bf16.msrb.mxu0 %v827_v45 }
  0x2b   :  { %503 = vmatpush.bf16.msrb.mxu1 %v835_v46 }
  0x2e   :  { %491 = vmatpush.bf16.msrb.mxu0 %v826_v47 }
  0x2f   :  { %504 = vmatpush.bf16.msrb.mxu1 %v834_v48 }
  0x32   :  { %492 = vmatpush.bf16.msrb.mxu0 %v825_v49 }
  0x33   :  { %505 = vmatpush.bf16.msrb.mxu1 %v833_v50  ;;  %780 = vmatmul.msk.bf16.vlgmr.msrb.gmra.mxu2 %vm432_vm0, %v35_v54 }
  0x36   :  { %493 = vmatpush.bf16.msrb.mxu0 %v824_v52 }
  0x37   :  { %506 = vmatpush.bf16.msrb.mxu1 %v832_v53 }
  0x3a   :  { %494 = vmatpush.bf16.msrb.mxu0 %v823_v55 }
  0x3b   :  { %507 = vmatpush.bf16.msrb.mxu1 %v831_v56 }
  0x3e   :  { %495 = vmatpush.bf16.msrb.mxu0 %v822_v57 }
  0x3f   :  { %508 = vmatpush.bf16.msrb.mxu1 %v830_v58 }
  0x41   :  { %496 = vmatmul.bf16.vlgmr.msrb.gmra.mxu0 %v33_v61 }
  0x42   :  { %509 = vmatmul.bf16.vlgmr.msrb.gmra.mxu1 %v34_v62 }
  0x9e   :  { %v445_v0 = vpop.f32.mrf.mxu0 }
  0x9f   :  { %v458_v1 = vpop.f32.mrf.mxu1  ;;  %v446_v8 = vadd.f32 %v842_v7, %v445_v0 }
  0xa1   :  { %v459_v11 = vadd.f32 %v458_v1, %v446_v8 }
  0xa6   :  { %v447_v3 = vpop.f32.mrf.mxu0  ;;  %v471_v5 = vpop.f32.mrf.mxu2 }
  0xa7   :  { %v460_v4 = vpop.f32.mrf.mxu1  ;;  %v484_v6 = vpop.f32.mrf.mxu3  ;;  %v472_v12 = vadd.f32 %v471_v5, %v459_v11 }
  0xa9   :  { %v485_v14 = vadd.f32 %v484_v6, %v472_v12 }
  0xae   :  { %v473_v9 = vpop.f32.mrf.mxu2 }
  0xaf   :  { %v486_v10 = vpop.f32.mrf.mxu3 }
  0xb6   :  { %v523_v13 = vpop.f32.mrf.mxu2 }
  0xbe   :  { %v497_v15 = vpop.f32.mrf.mxu0  ;;  %v525_v19 = vpop.f32.mrf.mxu2 }
  0xbf   :  { %v510_v16 = vpop.f32.mrf.mxu1  ;;  %v498_v17 = vadd.f32 %v497_v15, %v485_v14 }
  0xc1   :  { %v511_v18 = vadd.f32 %v510_v16, %v498_v17 }
  0xc3   :  { %v524_v20 = vadd.f32 %v523_v13, %v511_v18 }
  0xc5   :  { %v527_v21 = vmax.f32 %v524_v20, 0.0 }
  0xc6   :  { %v499_v22 = vpop.f32.mrf.mxu0 }
  0xc7   :  { %v512_v23 = vpop.f32.mrf.mxu1  ;;  %v528_v24 = vpack.c.bf16 %v527_v21, %v527_v21 }
  0xc9   :  { %789 = vmatmul.msk.bf16.vlgmr.msrb.gmra.mxu3 %vm549_vm1, %v528_v24 }
 0x14c   :  { %v562_v26 = vpop.f32.mrf.mxu3 }
 0x14d   :  { %v563_v27 = vadd.f32 %v843_v25, %v562_v26 }
 0x14f   :  { %567 = vst.msk [vmem:[#allocation2] sm:$0xff] %vm566_vm2, %v563_v27 }
 0x150   :  { %578 = dma.vmem_to_hbm [thread:$0]  %s574_s10, 128, %s576_s13, [#allocation3]  }
 0x154   :  { %v564_v28 = vpop.f32.mrf.mxu3 }
 0x155   :  { %868 = dma.done.wait [#allocation3], 128  }
 0x156   :  { %869 = vsyncadd [#allocation3], 4294967168 }
 0x157   :  { %583 = vsyncpa [#allocation3], 1 }

</bundles_post_ra>
